<compile_context>
chip_gen: v7x
topology: tpu7x:2x2x1
jax: 0.10.0
libtpu: 0.0.40
codegen_flags: <defaults>
</compile_context>

<pallas_src>
import jax
import jax.numpy as jnp
from jax.experimental import pallas as pl
from jax.experimental.pallas import tpu as pltpu


def dann_kernel(x_ref, w1_ref, w2_ref, w36_ref, wa_ref, wb_ref, b_ref, out_ref):
    # packed-bias layout (128-aligned lane offsets inside one (1, 768) f32 vec)
    b1 = b_ref[:, 0:256]      # Linear(310,256)+BN256 folded bias
    b2 = b_ref[:, 256:384]    # Linear(256,128)+BN128 folded bias
    b36 = b_ref[:, 384:512]   # merged head-entry bias (class 0:64, domain 64:96)
    ba = b_ref[:, 512:576]    # block-diag tail-1 bias (b4 in 0:32, zeros in 32:64)
    bb = b_ref[:, 640:648]    # block-diag tail-2 bias (b5 in 0:4, b7 in 4:6)

    # ---- feature extractor (BN folded; bf16 inputs & weights, f32 MXU accum) ----
    x = x_ref[...]                                        # already bf16, K padded
    h = jnp.dot(x, w1_ref[...], preferred_element_type=jnp.float32) + b1
    h = jnp.maximum(h, 0.0)                               # ReLU
    f = jnp.dot(h.astype(jnp.bfloat16), w2_ref[...],
                preferred_element_type=jnp.float32) + b2
    f = jnp.maximum(f, 0.0)                               # Dropout(eval)=id, ReLU

    # ---- merged head-entry matmul: class 128->64 (cols 0:64) ++ domain 128->32
    #      (cols 64:96).  The ReLU applies to BOTH heads: the original model has
    #      a ReLU after the first domain layer, so this is intentional. ----
    cd = jnp.dot(f.astype(jnp.bfloat16), w36_ref[...],
                 preferred_element_type=jnp.float32) + b36
    cd = jnp.maximum(cd, 0.0)

    # ---- block-diagonal tail 1: [w4 (64x32) | I32] -> lanes 0:32 class hidden,
    #      lanes 32:64 domain features passed through.  The ReLU is a no-op on
    #      lanes 32:64 (already >= 0 after the cd ReLU, zero bias there). ----
    e = jnp.dot(cd.astype(jnp.bfloat16), wa_ref[...],
                preferred_element_type=jnp.float32) + ba
    e = jnp.maximum(e, 0.0)                               # Dropout(eval)=id, ReLU

    # ---- block-diagonal tail 2: [w5 (32x4) | w7 (32x2)] -> (TB, 8) logits:
    #      lanes 0:4 class, lanes 4:6 domain (ReverseLayer forward == identity)
    g = jnp.dot(e.astype(jnp.bfloat16), wb_ref[...],
                preferred_element_type=jnp.float32) + bb

    # masked log-softmax over lanes 0:4 (class) and lanes 4:6 (domain)
    lane = jax.lax.broadcasted_iota(jnp.int32, g.shape, 1)
    cmask = lane < 4
    dmask = jnp.logical_and(lane >= 4, lane < 6)
    mc = jnp.max(jnp.where(cmask, g, -jnp.inf), axis=-1, keepdims=True)
    md = jnp.max(jnp.where(dmask, g, -jnp.inf), axis=-1, keepdims=True)
    sc = jnp.sum(jnp.where(cmask, jnp.exp(g - mc), 0.0), axis=-1, keepdims=True)
    sd = jnp.sum(jnp.where(dmask, jnp.exp(g - md), 0.0), axis=-1, keepdims=True)
    out_ref[...] = jnp.where(cmask, g - mc - jnp.log(sc), g - md - jnp.log(sd))


def _round_up(n, m):
    return ((n + m - 1) // m) * m


def _batch_tile(B):
    # As large as possible (amortize ~0.35 us fixed per grid step) but capped at
    # 1024 and chosen so nb >= 2 whenever B allows it (v7x: 2 TCs share the
    # "parallel" batch axis).  16-row alignment keeps bf16 sublane packing dense.
    return max(16, min(1024, _round_up(pl.cdiv(B, 2), 16)))


@jax.jit
def dann_forward(x, kernel_params):
    w1, w2, w36, wa, wb, bvec = kernel_params
    B = x.shape[0]
    TB = _batch_tile(B)
    nb = pl.cdiv(B, TB)
    Bp = nb * TB

    # pad batch -> Bp and features 310 -> 384, cast to bf16 (halves the dominant
    # HBM stream); allow_input_fusion permits XLA to fuse this producer into the
    # pallas_call operand instead of materializing an extra HBM copy.
    xp = (jnp.zeros((Bp, 384), jnp.bfloat16)
          .at[:B, :x.shape[1]].set(x.astype(jnp.bfloat16)))

    out = pl.pallas_call(
        dann_kernel,
        out_shape=jax.ShapeDtypeStruct((Bp, 8), jnp.float32),
        grid_spec=pltpu.PrefetchScalarGridSpec(
            num_scalar_prefetch=0,
            grid=(nb,),
            in_specs=[
                pl.BlockSpec((TB, 384), lambda i: (i, 0)),    # x (bf16, streamed)
                # weights / biases: constant block index -> DMA'd once,
                # VMEM-resident across all batch grid steps
                pl.BlockSpec((384, 256), lambda i: (0, 0)),   # w1 (bf16, K padded)
                pl.BlockSpec((256, 128), lambda i: (0, 0)),   # w2 (bf16)
                pl.BlockSpec((128, 128), lambda i: (0, 0)),   # merged head (bf16)
                pl.BlockSpec((128, 64), lambda i: (0, 0)),    # [w4 | I32] (bf16)
                pl.BlockSpec((64, 8), lambda i: (0, 0)),      # [w5 | w7] (bf16)
                pl.BlockSpec((1, 768), lambda i: (0, 0)),     # packed biases (f32)
            ],
            out_specs=pl.BlockSpec((TB, 8), lambda i: (i, 0)),
        ),
        compiler_params=pltpu.CompilerParams(
            dimension_semantics=("parallel",),               # v7x: 2-TC split
            allow_input_fusion=[True, False, False, False, False, False, False]),
    )(xp, w1, w2, w36, wa, wb, bvec)

    return out[:B, 0:4], out[:B, 4:6]


# ------------------------- parameter construction ---------------------------

def make_linear(key, in_f, out_f):
    k1, k2 = jax.random.split(key)
    bound = 1.0 / (in_f ** 0.5)
    w = jax.random.uniform(k1, (in_f, out_f), jnp.float32, -bound, bound)
    b = jax.random.uniform(k2, (1, out_f), jnp.float32, -bound, bound)
    return w, b


def make_bn(key, n, eps=1e-5):
    # eval-mode BN folded into scale/shift:  y = x*scale + shift
    k1, k2, k3 = jax.random.split(key, 3)
    gamma = 1.0 + 0.1 * jax.random.normal(k1, (1, n), jnp.float32)
    beta = 0.1 * jax.random.normal(k2, (1, n), jnp.float32)
    mean = 0.1 * jax.random.normal(k3, (1, n), jnp.float32)
    var = jnp.ones((1, n), jnp.float32)
    scale = gamma / jnp.sqrt(var + eps)
    shift = beta - mean * scale
    return scale, shift


def init_params(key):
    ks = jax.random.split(key, 12)
    w1, b1 = make_linear(ks[0], 310, 256); s1, t1 = make_bn(ks[1], 256)
    w2, b2 = make_linear(ks[2], 256, 128); s2, t2 = make_bn(ks[3], 128)
    w3, b3 = make_linear(ks[4], 128, 64);  s3, t3 = make_bn(ks[5], 64)
    w4, b4 = make_linear(ks[6], 64, 32);   s4, t4 = make_bn(ks[7], 32)
    w5, b5 = make_linear(ks[8], 32, 4)
    w6, b6 = make_linear(ks[9], 128, 32);  s6, t6 = make_bn(ks[10], 32)
    w7, b7 = make_linear(ks[11], 32, 2)
    return (w1, b1, s1, t1, w2, b2, s2, t2,
            w3, b3, s3, t3, w4, b4, s4, t4, w5, b5,
            w6, b6, s6, t6, w7, b7)


def pack_params(params):
    """Offline prep: fold eval BN into Linear, pad K=310->384, merge head-entry
    matmuls, build block-diagonal tails, cast all weights to bf16, and pack all
    biases into one lane-aligned f32 vector."""
    (w1, b1, s1, t1, w2, b2, s2, t2,
     w3, b3, s3, t3, w4, b4, s4, t4, w5, b5,
     w6, b6, s6, t6, w7, b7) = params

    # fold eval BN:  (x@W + b)*s + t  ->  x@(W*s) + (b*s + t)
    w1f, b1f = w1 * s1, b1 * s1 + t1
    w2f, b2f = w2 * s2, b2 * s2 + t2
    w3f, b3f = w3 * s3, b3 * s3 + t3
    w4f, b4f = w4 * s4, b4 * s4 + t4
    w6f, b6f = w6 * s6, b6 * s6 + t6

    # zero-pad contraction dim of layer 1: 310 -> 384
    w1p = jnp.zeros((384, 256), jnp.float32).at[:310].set(w1f)

    # merged head entries sharing f: class (128,64) cols 0:64, domain (128,32)
    # cols 64:96
    w36 = (jnp.zeros((128, 128), jnp.float32)
           .at[:, 0:64].set(w3f).at[:, 64:96].set(w6f))
    b36 = (jnp.zeros((1, 128), jnp.float32)
           .at[:, 0:64].set(b3f).at[:, 64:96].set(b6f))

    # block-diagonal tail 1: [w4 | I32]  (class 64->32, domain pass-through)
    wa = (jnp.zeros((128, 64), jnp.float32)
          .at[0:64, 0:32].set(w4f)
          .at[64:96, 32:64].set(jnp.eye(32, dtype=jnp.float32)))
    ba = jnp.zeros((1, 64), jnp.float32).at[:, 0:32].set(b4f)

    # block-diagonal tail 2: [w5 | w7] -> 8 lanes (4 class logits + 2 domain)
    wb = (jnp.zeros((64, 8), jnp.float32)
          .at[0:32, 0:4].set(w5).at[32:64, 4:6].set(w7))
    bb = jnp.zeros((1, 8), jnp.float32).at[:, 0:4].set(b5).at[:, 4:6].set(b7)

    # pack all biases at 128-aligned lane offsets into one (1, 768) f32 vector
    bvec = (jnp.zeros((1, 768), jnp.float32)
            .at[:, 0:256].set(b1f)
            .at[:, 256:384].set(b2f)
            .at[:, 384:512].set(b36)
            .at[:, 512:576].set(ba)
            .at[:, 640:648].set(bb))

    bf16 = jnp.bfloat16
    return (w1p.astype(bf16), w2f.astype(bf16), w36.astype(bf16),
            wa.astype(bf16), wb.astype(bf16), bvec)


def dann_forward_ref(x, kernel_params):
    """Plain-JAX reference performing the identical folded / bf16-quantized math."""
    w1, w2, w36, wa, wb, bvec = kernel_params
    b1, b2 = bvec[:, 0:256], bvec[:, 256:384]
    b36, ba, bb = bvec[:, 384:512], bvec[:, 512:576], bvec[:, 640:648]

    xp = (jnp.zeros((x.shape[0], 384), jnp.bfloat16)
          .at[:, :x.shape[1]].set(x.astype(jnp.bfloat16)))
    h = jnp.maximum(jnp.dot(xp, w1, preferred_element_type=jnp.float32) + b1, 0.0)
    f = jnp.maximum(jnp.dot(h.astype(jnp.bfloat16), w2,
                            preferred_element_type=jnp.float32) + b2, 0.0)
    cd = jnp.maximum(jnp.dot(f.astype(jnp.bfloat16), w36,
                             preferred_element_type=jnp.float32) + b36, 0.0)
    e = jnp.maximum(jnp.dot(cd.astype(jnp.bfloat16), wa,
                            preferred_element_type=jnp.float32) + ba, 0.0)
    g = jnp.dot(e.astype(jnp.bfloat16), wb,
                preferred_element_type=jnp.float32) + bb
    return (jax.nn.log_softmax(g[:, 0:4], axis=1),
            jax.nn.log_softmax(g[:, 4:6], axis=1))


if __name__ == "__main__":
    key = jax.random.PRNGKey(0)
    kx, kp = jax.random.split(key)

    B = 8
    x = jax.random.normal(kx, (B, 310), jnp.float32)
    kernel_params = pack_params(init_params(kp))

    class_pred, domain_pred = dann_forward(x, kernel_params)
    jax.block_until_ready((class_pred, domain_pred))

    assert class_pred.shape == (B, 4) and domain_pred.shape == (B, 2)

    ref_c, ref_d = dann_forward_ref(x, kernel_params)
    assert jnp.allclose(class_pred, ref_c, atol=2e-3, rtol=2e-3)
    assert jnp.allclose(domain_pred, ref_d, atol=2e-3, rtol=2e-3)

    print("KERNEL_OK")
</pallas_src>

<mosaic_0001>
module attributes {stable_mosaic.version = 11 : i64} {
  func.func @dann_kernel(%arg0: i32, %arg1: memref<16x384xbf16, #tpu.memory_space<vmem>>, %arg2: memref<384x256xbf16, #tpu.memory_space<vmem>>, %arg3: memref<256x128xbf16, #tpu.memory_space<vmem>>, %arg4: memref<128x128xbf16, #tpu.memory_space<vmem>>, %arg5: memref<128x64xbf16, #tpu.memory_space<vmem>>, %arg6: memref<64x8xbf16, #tpu.memory_space<vmem>>, %arg7: memref<1x768xf32, #tpu.memory_space<vmem>>, %arg8: memref<16x8xf32, #tpu.memory_space<vmem>>) attributes {dimension_semantics = [#tpu.dimension_semantics<parallel>], iteration_bounds = array<i64: 1>, scalar_prefetch = 0 : i64, scratch_operands = 0 : i64, tpu.core_type = #tpu.core_type<tc>, window_params = [{transform_indices = @transform_0, window_bounds = array<i64: 16, 384>}, {pipeline_mode = #tpu.pipeline_mode<synchronous>, transform_indices = @transform_1, window_bounds = array<i64: 384, 256>}, {pipeline_mode = #tpu.pipeline_mode<synchronous>, transform_indices = @transform_2, window_bounds = array<i64: 256, 128>}, {pipeline_mode = #tpu.pipeline_mode<synchronous>, transform_indices = @transform_3, window_bounds = array<i64: 128, 128>}, {pipeline_mode = #tpu.pipeline_mode<synchronous>, transform_indices = @transform_4, window_bounds = array<i64: 128, 64>}, {pipeline_mode = #tpu.pipeline_mode<synchronous>, transform_indices = @transform_5, window_bounds = array<i64: 64, 8>}, {pipeline_mode = #tpu.pipeline_mode<synchronous>, transform_indices = @transform_6, window_bounds = array<i64: 1, 768>}, {transform_indices = @transform_7, window_bounds = array<i64: 16, 8>}]} {
    %c0 = arith.constant 0 : index
    %c0_0 = arith.constant 0 : index
    %0 = vector.load %arg7[%c0, %c0_0] : memref<1x768xf32, #tpu.memory_space<vmem>>, vector<1x256xf32>
    %c0_1 = arith.constant 0 : index
    %c256 = arith.constant 256 : index
    %1 = vector.load %arg7[%c0_1, %c256] : memref<1x768xf32, #tpu.memory_space<vmem>>, vector<1x128xf32>
    %c0_2 = arith.constant 0 : index
    %c384 = arith.constant 384 : index
    %2 = vector.load %arg7[%c0_2, %c384] : memref<1x768xf32, #tpu.memory_space<vmem>>, vector<1x128xf32>
    %c0_3 = arith.constant 0 : index
    %c512 = arith.constant 512 : index
    %3 = vector.load %arg7[%c0_3, %c512] : memref<1x768xf32, #tpu.memory_space<vmem>>, vector<1x64xf32>
    %c0_4 = arith.constant 0 : index
    %c640 = arith.constant 640 : index
    %4 = vector.load %arg7[%c0_4, %c640] : memref<1x768xf32, #tpu.memory_space<vmem>>, vector<1x8xf32>
    %c0_5 = arith.constant 0 : index
    %c0_6 = arith.constant 0 : index
    %5 = vector.load %arg1[%c0_5, %c0_6] : memref<16x384xbf16, #tpu.memory_space<vmem>>, vector<16x384xbf16>
    %c0_7 = arith.constant 0 : index
    %c0_8 = arith.constant 0 : index
    %6 = vector.load %arg2[%c0_7, %c0_8] : memref<384x256xbf16, #tpu.memory_space<vmem>>, vector<384x256xbf16>
    %cst = arith.constant dense<0.000000e+00> : vector<16x256xf32>
    %7 = tpu.matmul %5, %6, %cst {dimension_numbers = #tpu.dot_dimension_numbers<[1], [0], [0], [1], [0, 0, 1, 1], [], []>} : vector<16x384xbf16>, vector<384x256xbf16>, vector<16x256xf32> -> vector<16x256xf32>
    %8 = vector.broadcast %0 : vector<1x256xf32> to vector<16x256xf32>
    %9 = arith.addf %7, %8 : vector<16x256xf32>
    %cst_9 = arith.constant 0.000000e+00 : f32
    %10 = vector.broadcast %cst_9 : f32 to vector<16x256xf32>
    %11 = arith.maximumf %9, %10 : vector<16x256xf32>
    %12 = arith.truncf %11 : vector<16x256xf32> to vector<16x256xbf16>
    %c0_10 = arith.constant 0 : index
    %c0_11 = arith.constant 0 : index
    %13 = vector.load %arg3[%c0_10, %c0_11] : memref<256x128xbf16, #tpu.memory_space<vmem>>, vector<256x128xbf16>
    %cst_12 = arith.constant dense<0.000000e+00> : vector<16x128xf32>
    %14 = tpu.matmul %12, %13, %cst_12 {dimension_numbers = #tpu.dot_dimension_numbers<[1], [0], [0], [1], [0, 0, 1, 1], [], []>} : vector<16x256xbf16>, vector<256x128xbf16>, vector<16x128xf32> -> vector<16x128xf32>
    %15 = vector.broadcast %1 : vector<1x128xf32> to vector<16x128xf32>
    %16 = arith.addf %14, %15 : vector<16x128xf32>
    %cst_13 = arith.constant 0.000000e+00 : f32
    %17 = vector.broadcast %cst_13 : f32 to vector<16x128xf32>
    %18 = arith.maximumf %16, %17 : vector<16x128xf32>
    %19 = arith.truncf %18 : vector<16x128xf32> to vector<16x128xbf16>
    %c0_14 = arith.constant 0 : index
    %c0_15 = arith.constant 0 : index
    %20 = vector.load %arg4[%c0_14, %c0_15] : memref<128x128xbf16, #tpu.memory_space<vmem>>, vector<128x128xbf16>
    %cst_16 = arith.constant dense<0.000000e+00> : vector<16x128xf32>
    %21 = tpu.matmul %19, %20, %cst_16 {dimension_numbers = #tpu.dot_dimension_numbers<[1], [0], [0], [1], [0, 0, 1, 1], [], []>} : vector<16x128xbf16>, vector<128x128xbf16>, vector<16x128xf32> -> vector<16x128xf32>
    %22 = vector.broadcast %2 : vector<1x128xf32> to vector<16x128xf32>
    %23 = arith.addf %21, %22 : vector<16x128xf32>
    %cst_17 = arith.constant 0.000000e+00 : f32
    %24 = vector.broadcast %cst_17 : f32 to vector<16x128xf32>
    %25 = arith.maximumf %23, %24 : vector<16x128xf32>
    %26 = arith.truncf %25 : vector<16x128xf32> to vector<16x128xbf16>
    %c0_18 = arith.constant 0 : index
    %c0_19 = arith.constant 0 : index
    %27 = vector.load %arg5[%c0_18, %c0_19] : memref<128x64xbf16, #tpu.memory_space<vmem>>, vector<128x64xbf16>
    %cst_20 = arith.constant dense<0.000000e+00> : vector<16x64xf32>
    %28 = tpu.matmul %26, %27, %cst_20 {dimension_numbers = #tpu.dot_dimension_numbers<[1], [0], [0], [1], [0, 0, 1, 1], [], []>} : vector<16x128xbf16>, vector<128x64xbf16>, vector<16x64xf32> -> vector<16x64xf32>
    %29 = vector.broadcast %3 : vector<1x64xf32> to vector<16x64xf32>
    %30 = arith.addf %28, %29 : vector<16x64xf32>
    %cst_21 = arith.constant 0.000000e+00 : f32
    %31 = vector.broadcast %cst_21 : f32 to vector<16x64xf32>
    %32 = arith.maximumf %30, %31 : vector<16x64xf32>
    %33 = arith.truncf %32 : vector<16x64xf32> to vector<16x64xbf16>
    %c0_22 = arith.constant 0 : index
    %c0_23 = arith.constant 0 : index
    %34 = vector.load %arg6[%c0_22, %c0_23] : memref<64x8xbf16, #tpu.memory_space<vmem>>, vector<64x8xbf16>
    %cst_24 = arith.constant dense<0.000000e+00> : vector<16x8xf32>
    %35 = tpu.matmul %33, %34, %cst_24 {dimension_numbers = #tpu.dot_dimension_numbers<[1], [0], [0], [1], [0, 0, 1, 1], [], []>} : vector<16x64xbf16>, vector<64x8xbf16>, vector<16x8xf32> -> vector<16x8xf32>
    %36 = vector.broadcast %4 : vector<1x8xf32> to vector<16x8xf32>
    %37 = arith.addf %35, %36 : vector<16x8xf32>
    %38 = tpu.iota {dimensions = array<i32: 1>} : vector<16x8xi32>
    %c4_i32 = arith.constant 4 : i32
    %39 = vector.broadcast %c4_i32 : i32 to vector<16x8xi32>
    %40 = arith.cmpi slt, %38, %39 : vector<16x8xi32>
    %c4_i32_25 = arith.constant 4 : i32
    %41 = vector.broadcast %c4_i32_25 : i32 to vector<16x8xi32>
    %42 = arith.cmpi sge, %38, %41 : vector<16x8xi32>
    %c6_i32 = arith.constant 6 : i32
    %43 = vector.broadcast %c6_i32 : i32 to vector<16x8xi32>
    %44 = arith.cmpi slt, %38, %43 : vector<16x8xi32>
    %45 = arith.andi %42, %44 : vector<16x8xi1>
    %cst_26 = arith.constant 0xFF800000 : f32
    %46 = vector.broadcast %cst_26 : f32 to vector<16x8xf32>
    %47 = arith.select %40, %37, %46 : vector<16x8xi1>, vector<16x8xf32>
    %cst_27 = arith.constant dense<0xFF800000> : vector<16xf32>
    %48 = vector.multi_reduction <maximumf>, %47, %cst_27 [1] : vector<16x8xf32> to vector<16xf32>
    %49 = vector.shape_cast %48 : vector<16xf32> to vector<16x1xf32>
    %cst_28 = arith.constant 0xFF800000 : f32
    %50 = vector.broadcast %cst_28 : f32 to vector<16x8xf32>
    %51 = arith.select %45, %37, %50 : vector<16x8xi1>, vector<16x8xf32>
    %cst_29 = arith.constant dense<0xFF800000> : vector<16xf32>
    %52 = vector.multi_reduction <maximumf>, %51, %cst_29 [1] : vector<16x8xf32> to vector<16xf32>
    %53 = vector.shape_cast %52 : vector<16xf32> to vector<16x1xf32>
    %54 = vector.broadcast %49 : vector<16x1xf32> to vector<16x8xf32>
    %55 = arith.subf %37, %54 : vector<16x8xf32>
    %56 = math.exp %55 : vector<16x8xf32>
    %cst_30 = arith.constant 0.000000e+00 : f32
    %57 = vector.broadcast %cst_30 : f32 to vector<16x8xf32>
    %58 = arith.select %40, %56, %57 : vector<16x8xi1>, vector<16x8xf32>
    %cst_31 = arith.constant dense<0.000000e+00> : vector<16xf32>
    %59 = vector.multi_reduction <add>, %58, %cst_31 [1] : vector<16x8xf32> to vector<16xf32>
    %60 = vector.shape_cast %59 : vector<16xf32> to vector<16x1xf32>
    %61 = vector.broadcast %53 : vector<16x1xf32> to vector<16x8xf32>
    %62 = arith.subf %37, %61 : vector<16x8xf32>
    %63 = math.exp %62 : vector<16x8xf32>
    %cst_32 = arith.constant 0.000000e+00 : f32
    %64 = vector.broadcast %cst_32 : f32 to vector<16x8xf32>
    %65 = arith.select %45, %63, %64 : vector<16x8xi1>, vector<16x8xf32>
    %cst_33 = arith.constant dense<0.000000e+00> : vector<16xf32>
    %66 = vector.multi_reduction <add>, %65, %cst_33 [1] : vector<16x8xf32> to vector<16xf32>
    %67 = vector.shape_cast %66 : vector<16xf32> to vector<16x1xf32>
    %68 = vector.broadcast %49 : vector<16x1xf32> to vector<16x8xf32>
    %69 = arith.subf %37, %68 : vector<16x8xf32>
    %70 = math.log %60 : vector<16x1xf32>
    %71 = vector.broadcast %70 : vector<16x1xf32> to vector<16x8xf32>
    %72 = arith.subf %69, %71 : vector<16x8xf32>
    %73 = vector.broadcast %53 : vector<16x1xf32> to vector<16x8xf32>
    %74 = arith.subf %37, %73 : vector<16x8xf32>
    %75 = math.log %67 : vector<16x1xf32>
    %76 = vector.broadcast %75 : vector<16x1xf32> to vector<16x8xf32>
    %77 = arith.subf %74, %76 : vector<16x8xf32>
    %78 = arith.select %40, %72, %77 : vector<16x8xi1>, vector<16x8xf32>
    %c0_34 = arith.constant 0 : index
    %c0_35 = arith.constant 0 : index
    %79 = vector.load %arg8[%c0_34, %c0_35] : memref<16x8xf32, #tpu.memory_space<vmem>>, vector<16x8xf32>
    tpu.vector_store %arg8[%c0_34, %c0_35], %78 {strides = array<i32>} : memref<16x8xf32, #tpu.memory_space<vmem>>, vector<16x8xf32>,
    return
  }
  func.func @transform_0(%arg0: i32) -> (i32, i32) {
    %c0_i32 = arith.constant 0 : i32
    %c0_i32_0 = arith.constant 0 : i32
    return %arg0, %c0_i32 : i32, i32
  }
  func.func @transform_1(%arg0: i32) -> (i32, i32) {
    %c0_i32 = arith.constant 0 : i32
    %c0_i32_0 = arith.constant 0 : i32
    %c0_i32_1 = arith.constant 0 : i32
    return %c0_i32, %c0_i32_0 : i32, i32
  }
  func.func @transform_2(%arg0: i32) -> (i32, i32) {
    %c0_i32 = arith.constant 0 : i32
    %c0_i32_0 = arith.constant 0 : i32
    %c0_i32_1 = arith.constant 0 : i32
    return %c0_i32, %c0_i32_0 : i32, i32
  }
  func.func @transform_3(%arg0: i32) -> (i32, i32) {
    %c0_i32 = arith.constant 0 : i32
    %c0_i32_0 = arith.constant 0 : i32
    %c0_i32_1 = arith.constant 0 : i32
    return %c0_i32, %c0_i32_0 : i32, i32
  }
  func.func @transform_4(%arg0: i32) -> (i32, i32) {
    %c0_i32 = arith.constant 0 : i32
    %c0_i32_0 = arith.constant 0 : i32
    %c0_i32_1 = arith.constant 0 : i32
    return %c0_i32, %c0_i32_0 : i32, i32
  }
  func.func @transform_5(%arg0: i32) -> (i32, i32) {
    %c0_i32 = arith.constant 0 : i32
    %c0_i32_0 = arith.constant 0 : i32
    %c0_i32_1 = arith.constant 0 : i32
    return %c0_i32, %c0_i32_0 : i32, i32
  }
  func.func @transform_6(%arg0: i32) -> (i32, i32) {
    %c0_i32 = arith.constant 0 : i32
    %c0_i32_0 = arith.constant 0 : i32
    %c0_i32_1 = arith.constant 0 : i32
    return %c0_i32, %c0_i32_0 : i32, i32
  }
  func.func @transform_7(%arg0: i32) -> (i32, i32) {
    %c0_i32 = arith.constant 0 : i32
    %c0_i32_0 = arith.constant 0 : i32
    return %arg0, %c0_i32 : i32, i32
  }
}

</mosaic_0001>

<bundles_post_ra>
// kernel: dann_forward.2
= control target key start
LH: loop header
LB: loop body
LE: loop exit
PB: predicated region body
PF: predicated region fallthrough
CT: control target
= control target key end

     0   :  { %s1775_s0 = inlined_call_operand.hbm [shape: bf16[384,256], index: 0, kind: input, shape index: {}]   ;;  %s1776_s1 = inlined_call_operand.vmem [shape: bf16[256,128], index: 1, kind: input, shape index: {}]   ;;  %s1777_s2 = inlined_call_operand.hbm [shape: bf16[128,128], index: 2, kind: input, shape index: {}]   ;;  %s1778_s3 = inlined_call_operand.vmem [shape: bf16[128,64], index: 3, kind: input, shape index: {}]   ;;  %s1779_s4 = inlined_call_operand.vmem [shape: bf16[64,8], index: 4, kind: input, shape index: {}]   ;;  %s1780_s5 = inlined_call_operand.vmem [shape: f32[1,768], index: 5, kind: input, shape index: {}]   ;;  %s1781_s6 = inlined_call_operand.vmem [shape: bf16[8,310], index: 6, kind: input, shape index: {}]   ;;  %s1782_s7 = inlined_call_operand.<no memory space> [shape: bf16[], index: 7, kind: input, shape index: {}]   ;;  %s1783_s8 = inlined_call_operand.vmem [shape: f32[16,8], index: 8, kind: output, shape index: {}]  }
   0x1   :  { %v13_v0 = vstv %s1782_s7 }
   0x2   :  { %v1566_v1 = vunpack.i.l.bf16 %v13_v0 }
   0x3   :  { %18 = vsyncpa [#allocation8], 0 }
   0x4   :  { %19 = vsyncpa [#allocation10], 0  ;;  %s1509_s29 = smov [#allocation7]   ;;  %s1461_s11 = scalar_lea.hbm %s1775_s0, 6144 }
   0x5   :  { %s27_s30 = sshll.u32 %s1509_s29, 4  ;;  %p1462_p0 = scmp.ne.s32.totalorder %s1775_s0, %s1461_s11  ;;  %s28_s30 = int_to_ptr.vmem [resolvable:$true] %s27_s30 }
   0x6   :  { %p1465_p1 = scmp.lt.u32.totalorder %s1461_s11, %s1775_s0 }
   0x8   :  { %p1467_p2 = pnand %p1465_p1, %p1462_p0 }
   0xa   :  { %1470 = shalt.err (!%p1467_p2)
}
   0xb   :  { %s1471_s7 = scalar_lea.vmem %s28_s30, 6144  ;;  %p1476_p4 = scmp.lt.s32.totalorder %s28_s30, %s28_s30 }
   0xc   :  { %p1472_p3 = scmp.ne.s32.totalorder %s28_s30, %s1471_s7  ;;  %p1477_p5 = scmp.lt.s32.totalorder %s1471_s7, %s1471_s7 }
   0xe   :  { %p1478_p6 = por %p1477_p5, %p1476_p4 }
  0x10   :  { %p1479_p7 = pnand %p1478_p6, %p1472_p3 }
  0x12   :  { %1482 = shalt.err (!%p1479_p7)
}
  0x13   :  { %s1510_s16 = smov 128   ;;  %s1511_s17 = smov 8  }
  0x14   :  { %33 = dma.hbm_to_vmem [thread:$0]  %s1775_s0, 6144, %s28_s30, [#allocation8], %s1510_s16, %s1510_s16, %s1511_s17  }
  0x15   :  { %s1512_s20 = smov [#allocation9]   ;;  %s1483_s24 = scalar_lea.hbm %s1777_s2, 1024 }
  0x16   :  { %s41_s21 = sshll.u32 %s1512_s20, 4  ;;  %p1484_p8 = scmp.ne.s32.totalorder %s1777_s2, %s1483_s24  ;;  %s42_s21 = int_to_ptr.vmem [resolvable:$true] %s41_s21 }
  0x17   :  { %p1487_p9 = scmp.lt.u32.totalorder %s1483_s24, %s1777_s2 }
  0x19   :  { %p1489_p10 = pnand %p1487_p9, %p1484_p8 }
  0x1b   :  { %1492 = shalt.err (!%p1489_p10)
}
  0x1c   :  { %s1493_s29 = scalar_lea.vmem %s42_s21, 1024  ;;  %p1498_p12 = scmp.lt.s32.totalorder %s42_s21, %s42_s21 }
  0x1d   :  { %p1494_p11 = scmp.ne.s32.totalorder %s42_s21, %s1493_s29  ;;  %p1499_p13 = scmp.lt.s32.totalorder %s1493_s29, %s1493_s29 }
  0x1f   :  { %p1500_p0 = por %p1499_p13, %p1498_p12 }
  0x21   :  { %p1501_p1 = pnand %p1500_p0, %p1494_p11 }
  0x23   :  { %1504 = shalt.err (!%p1501_p1)
}
  0x24   :  { %s1513_s0 = smov 64   ;;  %s1514_s30 = smov 4  }
  0x25   :  { %47 = dma.hbm_to_vmem [thread:$0]  %s1777_s2, 1024, %s42_s21, [#allocation10], %s1513_s0, %s1513_s0, %s1514_s30  }
  0x26   :  { %1505 = dma.done.wait [#allocation8], 6144  }
  0x27   :  { %1506 = vsyncadd [#allocation8], 4294961152 }
  0x28   :  { %1507 = dma.done.wait [#allocation10], 1024  }
  0x29   :  { %1508 = vsyncadd [#allocation10], 4294966272  ;;  %v1217_v2 = vpack.c.bf16 %v1566_v1, %v1566_v1  ;;  %v1333_v3 = vld [vmem:[#allocation7 + $0x4] ss:$8 sps:$4 sm:$0xff]   ;;  %v1335_v4 = vld [vmem:[#allocation7] ss:$8 sps:$4 sm:$0xff]   ;;  %v115_v10 = vlaneseq }
  0x2a   :  { %461 = vmatprep.subr.bf16.mxu0 %v1333_v3  ;;  %v1336_v5 = vld [vmem:[#allocation7 + $0x14] ss:$8 sps:$4 sm:$0xff]   ;;  %v1338_v6 = vld [vmem:[#allocation7 + $0x10] ss:$8 sps:$4 sm:$0xff]   ;;  %v1339_v7 = vld [vmem:[#allocation7 + $0x24] ss:$8 sps:$4 sm:$0xff]  }
  0x2b   :  { %1218 = vst [vmem:[#allocation11 + $0x10] sm:$0xff] %v1217_v2   ;;  %462 = vmatpush1.bf16.msra.mxu0 %v1335_v4  ;;  %v1341_v8 = vld [vmem:[#allocation7 + $0x20] ss:$8 sps:$4 sm:$0xff]   ;;  %v1342_v9 = vld [vmem:[#allocation7 + $0x34] ss:$8 sps:$4 sm:$0xff]   ;;  %v1595_v13 = vand.u32 127, %v115_v10 }
  0x2c   :  { %463 = vmatprep.subr.bf16.mxu0 %v1336_v5  ;;  %v1344_v11 = vld [vmem:[#allocation7 + $0x30] ss:$8 sps:$4 sm:$0xff]   ;;  %v1345_v12 = vld [vmem:[#allocation7 + $0x44] ss:$8 sps:$4 sm:$0xff]   ;;  %v1347_v14 = vld [vmem:[#allocation7 + $0x40] ss:$8 sps:$4 sm:$0xff]  }
  0x2d   :  { %v1348_v15 = vld [vmem:[#allocation7 + $0x54] ss:$8 sps:$4 sm:$0xff]   ;;  %v117_v16 = vadd.s32 256, %v1595_v13  ;;  %v1350_v17 = vld [vmem:[#allocation7 + $0x50] ss:$8 sps:$4 sm:$0xff]   ;;  %v69_v19 = vld [vmem:[%s1781_s6] sm:$0xff]  }
  0x2e   :  { %v1351_v18 = vld [vmem:[#allocation7 + $0x64] ss:$8 sps:$4 sm:$0xff]   ;;  %v1116_v20 = vld [vmem:[%s1781_s6 + $0x8] sm:$0xf]  ;;  %79 = vst [vmem:[#allocation11] sm:$0xff] %v69_v19   ;;  %v1413_v38 = vld [vmem:[%s1776_s1 + $0x50] sm:$0xff]  }
  0x2f   :  { %464 = vmatpush1.bf16.msra.mxu0 %v1338_v6  ;;  %vm118_vm0 = vcmp.lt.s32.totalorder %v117_v16, 310  ;;  %v113_v21 = vunpack.c.l.bf16 %v1116_v20  ;;  %v1353_v22 = vld [vmem:[#allocation7 + $0x60] ss:$8 sps:$4 sm:$0xff]   ;;  %v1354_v23 = vld [vmem:[#allocation7 + $0x74] ss:$8 sps:$4 sm:$0xff]   ;;  %v1515_v60 = vmov 0  }
  0x30   :  { %465 = vmatprep.subr.bf16.mxu0 %v1339_v7  ;;  %v1356_v26 = vld [vmem:[#allocation7 + $0x70] ss:$8 sps:$4 sm:$0xff]   ;;  %v1357_v27 = vld [vmem:[#allocation7 + $0x84] ss:$8 sps:$4 sm:$0xff]   ;;  %v1359_v28 = vld [vmem:[#allocation7 + $0x80] ss:$8 sps:$4 sm:$0xff]  }
  0x31   :  { %v119_v24 = vsel %vm118_vm0, %v113_v21, %v1566_v1  ;;  %v1360_v29 = vld [vmem:[#allocation7 + $0x94] ss:$8 sps:$4 sm:$0xff]   ;;  %v1362_v30 = vld [vmem:[#allocation7 + $0x90] ss:$8 sps:$4 sm:$0xff]   ;;  %v1363_v32 = vld [vmem:[#allocation7 + $0xa4] ss:$8 sps:$4 sm:$0xff]  }
  0x32   :  { %v1212_v25 = vpack.c.bf16 %v1566_v1, %v119_v24  ;;  %v1409_v33 = vld [vmem:[%s1776_s1 + $0x40] sm:$0xff]   ;;  %v1411_v36 = vld [vmem:[%s1776_s1 + $0x48] sm:$0xff]   ;;  %v1366_v39 = vld [vmem:[#allocation7 + $0xb4] ss:$8 sps:$4 sm:$0xff]   ;;  %vm1517_vm1 = vmmov 0   ;;  %vm997_vm2 = vcmask 523264  }
  0x33   :  { %466 = vmatpush1.bf16.msra.mxu0 %v1341_v8  ;;  %v1410_v34 = vld [vmem:[%s1776_s1] sm:$0xff]   ;;  %1219 = vmatprep.subr.bf16.mxu1 %v1409_v33  ;;  %v1412_v37 = vld [vmem:[%s1776_s1 + $0x8] sm:$0xff]   ;;  %v1368_v40 = vld [vmem:[#allocation7 + $0xb0] ss:$8 sps:$4 sm:$0xff]   ;;  %vm1045_vm3 = vcmp.ge.s32.totalorder %v1595_v13, 4  ;;  %vm1046_vm4 = vcmp.lt.s32.totalorder %v1595_v13, 6 }
  0x34   :  { %467 = vmatprep.subr.bf16.mxu0 %v1342_v9  ;;  %1213 = vst [vmem:[#allocation11 + $0x8] sm:$0xff] %v1212_v25   ;;  %v1365_v35 = vld [vmem:[#allocation7 + $0xa0] ss:$8 sps:$4 sm:$0xff]   ;;  %1220 = vmatpush3.bf16.msra.mxu1 %v1410_v34  ;;  %v1414_v41 = vld [vmem:[%s1776_s1 + $0x10] sm:$0xff]   ;;  %v1415_v42 = vld [vmem:[%s1776_s1 + $0x58] sm:$0xff]   ;;  %vm1044_vm6 = vcmp.lt.s32.totalorder %v1595_v13, 4 }
  0x35   :  { %v1383_v31 = vld [vmem:[#allocation11 + $0x4] ss:$12 sps:$4 sm:$0xff]   ;;  %1221 = vmatprep.subr.bf16.mxu1 %v1411_v36  ;;  %v1371_v44 = vld [vmem:[#allocation7 + $0xc0] ss:$8 sps:$4 sm:$0xff]   ;;  %v1416_v45 = vld [vmem:[%s1776_s1 + $0x18] sm:$0xff]   ;;  %vm1050_vm7 = vcmask 64512  }
  0x36   :  { %493 = vmatprep.mubr.bf16.mxu0 %v1383_v31  ;;  %v1369_v43 = vld [vmem:[#allocation7 + $0xc4] ss:$8 sps:$4 sm:$0xff]   ;;  %v1372_v46 = vld [vmem:[#allocation7 + $0xd4] ss:$8 sps:$4 sm:$0xff]   ;;  %v1374_v49 = vld [vmem:[#allocation7 + $0xd0] ss:$8 sps:$4 sm:$0xff]  }
  0x37   :  { %468 = vmatpush1.bf16.msra.mxu0 %v1344_v11  ;;  %v1417_v47 = vld [vmem:[%s1776_s1 + $0x60] sm:$0xff]   ;;  %v1419_v50 = vld [vmem:[%s1776_s1 + $0x68] sm:$0xff]   ;;  %v1378_v53 = vld [vmem:[#allocation7 + $0xf4] ss:$8 sps:$4 sm:$0xff]  }
  0x38   :  { %469 = vmatprep.subr.bf16.mxu0 %v1345_v12  ;;  %1222 = vmatpush3.bf16.msra.mxu1 %v1412_v37  ;;  %v1418_v48 = vld [vmem:[%s1776_s1 + $0x20] sm:$0xff]   ;;  %v1380_v54 = vld [vmem:[#allocation7 + $0xf0] ss:$8 sps:$4 sm:$0xff]   ;;  %v1389_v58 = vld [vmem:[#allocation7 + $0x114] ss:$8 sps:$4 sm:$0xff]  }
  0x39   :  { %1223 = vmatprep.subr.bf16.mxu1 %v1413_v38  ;;  %v1375_v51 = vld [vmem:[#allocation7 + $0xe4] ss:$8 sps:$4 sm:$0xff]   ;;  %v1377_v52 = vld [vmem:[#allocation7 + $0xe0] ss:$8 sps:$4 sm:$0xff]   ;;  %v1387_v59 = vld [vmem:[#allocation7 + $0x110] ss:$8 sps:$4 sm:$0xff]  }
  0x3a   :  { %v1386_v55 = vld [vmem:[#allocation7 + $0x104] ss:$8 sps:$4 sm:$0xff]   ;;  %v1384_v57 = vld [vmem:[#allocation7 + $0x100] ss:$8 sps:$4 sm:$0xff]   ;;  %v1395_v63 = vld [vmem:[#allocation7 + $0x134] ss:$8 sps:$4 sm:$0xff]  }
  0x3b   :  { %470 = vmatpush1.bf16.msra.mxu0 %v1347_v14  ;;  %v1381_v56 = vld [vmem:[#allocation11] ss:$12 sps:$4 sm:$0xff]   ;;  %v1393_v0 = vld [vmem:[#allocation7 + $0x130] ss:$8 sps:$4 sm:$0xff]   ;;  %v1401_v3 = vld [vmem:[#allocation7 + $0x154] ss:$8 sps:$4 sm:$0xff]  }
  0x3c   :  { %471 = vmatprep.subr.bf16.mxu0 %v1348_v15  ;;  %1224 = vmatpush3.bf16.msra.mxu1 %v1414_v41  ;;  %v1392_v61 = vld [vmem:[#allocation7 + $0x124] ss:$8 sps:$4 sm:$0xff]   ;;  %v1390_v62 = vld [vmem:[#allocation7 + $0x120] ss:$8 sps:$4 sm:$0xff]   ;;  %v1399_v4 = vld [vmem:[#allocation7 + $0x150] ss:$8 sps:$4 sm:$0xff]  }
  0x3d   :  { %1225 = vmatprep.subr.bf16.mxu1 %v1415_v42  ;;  %v1398_v1 = vld [vmem:[#allocation7 + $0x144] ss:$8 sps:$4 sm:$0xff]   ;;  %v1396_v2 = vld [vmem:[#allocation7 + $0x140] ss:$8 sps:$4 sm:$0xff]   ;;  %v1407_v7 = vld [vmem:[#allocation7 + $0x174] ss:$8 sps:$4 sm:$0xff]  }
  0x3e   :  { %v1404_v5 = vld [vmem:[#allocation7 + $0x164] ss:$8 sps:$4 sm:$0xff]   ;;  %v1402_v6 = vld [vmem:[#allocation7 + $0x160] ss:$8 sps:$4 sm:$0xff]   ;;  %v1405_v8 = vld [vmem:[#allocation7 + $0x170] ss:$8 sps:$4 sm:$0xff]  }
  0x3f   :  { %472 = vmatpush1.bf16.msra.mxu0 %v1350_v17  ;;  %v1408_v9 = vld [vmem:[#allocation11 + $0x8] ss:$12 sps:$4 sm:$0xff]   ;;  %v1423_v15 = vld [vmem:[%s1776_s1 + $0x78] sm:$0xff]   ;;  %v1516_v17 = vmov 0.0   ;;  %v137_v20 = vld [vmem:[%s1780_s5] sm:$0x3] }
  0x40   :  { %473 = vmatprep.subr.bf16.mxu0 %v1351_v18  ;;  %1226 = vmatpush3.bf16.msra.mxu1 %v1416_v45  ;;  %v1420_v11 = vld [vmem:[%s1776_s1 + $0x28] sm:$0xff]   ;;  %v1421_v12 = vld [vmem:[%s1776_s1 + $0x70] sm:$0xff]   ;;  %v1424_v16 = vld [vmem:[%s1776_s1 + $0x38] sm:$0xff]   ;;  %v196_v18 = vshrl.u32 %v115_v10, 7 }
  0x41   :  { %1227 = vmatprep.subr.bf16.mxu1 %v1417_v47  ;;  %v1422_v14 = vld [vmem:[%s1776_s1 + $0x30] sm:$0xff]   ;;  %v1425_v37 = vld [vmem:[#allocation9] sm:$0xff]   ;;  %v1426_v38 = vld [vmem:[#allocation9 + $0x8] sm:$0xff]  }
  0x42   :  { %v197_v19 = vsub.s32 0, %v196_v18  ;;  %v201_v21 = vsub.s32 1, %v196_v18  ;;  %v1429_v41 = vld [vmem:[#allocation9 + $0x20] sm:$0xff]   ;;  %v1430_v42 = vld [vmem:[#allocation9 + $0x28] sm:$0xff]   ;;  %vm1734_vm5 = vmand %vm1045_vm3, %vm1046_vm4 }
  0x43   :  { %474 = vmatpush1.bf16.msra.mxu0 %v1353_v22  ;;  %v1194_v18 = vld [vmem:[%s1780_s5 + $0x4] ss:$0 sm:$0xff] }
  0x44   :  { %475 = vmatprep.subr.bf16.mxu0 %v1354_v23  ;;  %1228 = vmatpush3.bf16.msra.mxu1 %v1418_v48  ;;  %v198_v22 = vrot.slane %v137_v20, %v197_v19  ;;  %v202_v23 = vrot.slane %v137_v20, %v201_v21 }
  0x45   :  { %1229 = vmatprep.subr.bf16.mxu1 %v1419_v50 }
  0x47   :  { %476 = vmatpush1.bf16.msra.mxu0 %v1356_v26 }
  0x48   :  { %477 = vmatprep.subr.bf16.mxu0 %v1357_v27  ;;  %1230 = vmatpush3.bf16.msra.mxu1 %v1420_v11 }
  0x49   :  { %1231 = vmatprep.subr.bf16.mxu1 %v1421_v12 }
  0x4b   :  { %478 = vmatpush1.bf16.msra.mxu0 %v1359_v28 }
  0x4c   :  { %479 = vmatprep.subr.bf16.mxu0 %v1360_v29  ;;  %1232 = vmatpush3.bf16.msra.mxu1 %v1422_v14 }
  0x4d   :  { %1233 = vmatprep.subr.bf16.mxu1 %v1423_v15  ;;  %v1443_v15 = vld [vmem:[%s1779_s4 + $0x10] sm:$0xff]  }
  0x4f   :  { %480 = vmatpush1.bf16.msra.mxu0 %v1362_v30 }
  0x50   :  { %481 = vmatprep.subr.bf16.mxu0 %v1363_v32  ;;  %1234 = vmatpush3.bf16.msra.mxu1 %v1424_v16  ;;  %v1444_v16 = vld [vmem:[%s1779_s4 + $0x18] sm:$0xff]  }
  0x51   :  { %1264 = vmatprep.subr.bf16.mxu1 %v1516_v17 }
  0x53   :  { %482 = vmatpush1.bf16.msra.mxu0 %v1365_v35 }
  0x54   :  { %483 = vmatprep.subr.bf16.mxu0 %v1366_v39  ;;  %v1427_v39 = vld [vmem:[#allocation9 + $0x10] sm:$0xff]  }
  0x57   :  { %484 = vmatpush1.bf16.msra.mxu0 %v1368_v40  ;;  %v1428_v40 = vld [vmem:[#allocation9 + $0x18] sm:$0xff]  }
  0x58   :  { %485 = vmatprep.subr.bf16.mxu0 %v1369_v43  ;;  %v1431_v43 = vld [vmem:[#allocation9 + $0x30] sm:$0xff]  }
  0x5b   :  { %486 = vmatpush1.bf16.msra.mxu0 %v1371_v44  ;;  %v1432_v44 = vld [vmem:[#allocation9 + $0x38] sm:$0xff]  }
  0x5c   :  { %487 = vmatprep.subr.bf16.mxu0 %v1372_v46  ;;  %v1168_v46 = vld [vmem:[%s1780_s5 + $0x2] ss:$0 sm:$0xff] }
  0x5f   :  { %488 = vmatpush1.bf16.msra.mxu0 %v1374_v49 }
  0x60   :  { %489 = vmatprep.subr.bf16.mxu0 %v1375_v51 }
  0x63   :  { %490 = vmatpush1.bf16.msra.mxu0 %v1377_v52 }
  0x64   :  { %491 = vmatprep.subr.bf16.mxu0 %v1378_v53 }
  0x67   :  { %492 = vmatpush1.bf16.msra.mxu0 %v1380_v54 }
  0x68   :  { %504 = vmatprep.subr.bf16.mxu0 %v1386_v55 }
  0x6a   :  { %494 = vmatmul.mubr.bf16.vlgmr.msra.gmra.mrb[0].mxu0 %v1381_v56  ;;  %v1433_v56 = vld [vmem:[%s1778_s3] sm:$0xff]  }
  0x6b   :  { %505 = vmatpush1.bf16.msra.mxu0 %v1384_v57  ;;  %536 = vmatprep.mubr.bf16.mxu0 %v1515_v60  ;;  %v1436_v60 = vld [vmem:[%s1778_s3 + $0x18] sm:$0xff]  }
  0x6c   :  { %506 = vmatprep.subr.bf16.mxu0 %v1389_v58  ;;  %v1434_v58 = vld [vmem:[%s1778_s3 + $0x8] sm:$0xff]  }
  0x6f   :  { %507 = vmatpush1.bf16.msra.mxu0 %v1387_v59  ;;  %v1435_v59 = vld [vmem:[%s1778_s3 + $0x10] sm:$0xff]  }
  0x70   :  { %508 = vmatprep.subr.bf16.mxu0 %v1392_v61  ;;  %v1437_v61 = vld [vmem:[%s1778_s3 + $0x20] sm:$0xff]  }
  0x73   :  { %509 = vmatpush1.bf16.msra.mxu0 %v1390_v62  ;;  %v1438_v62 = vld [vmem:[%s1778_s3 + $0x28] sm:$0xff]  }
  0x74   :  { %510 = vmatprep.subr.bf16.mxu0 %v1395_v63  ;;  %v1439_v63 = vld [vmem:[%s1778_s3 + $0x30] sm:$0xff]  }
  0x77   :  { %511 = vmatpush1.bf16.msra.mxu0 %v1393_v0  ;;  %v1440_v0 = vld [vmem:[%s1778_s3 + $0x38] sm:$0xff]  }
  0x78   :  { %512 = vmatprep.subr.bf16.mxu0 %v1398_v1  ;;  %v1441_v1 = vld [vmem:[%s1779_s4] sm:$0xff]  }
  0x7b   :  { %513 = vmatpush1.bf16.msra.mxu0 %v1396_v2  ;;  %v1442_v2 = vld [vmem:[%s1779_s4 + $0x8] sm:$0xff]  }
  0x7c   :  { %514 = vmatprep.subr.bf16.mxu0 %v1401_v3  ;;  %v1185_v3 = vld [vmem:[%s1780_s5 + $0x3] ss:$0 sm:$0xff] }
  0x7f   :  { %515 = vmatpush1.bf16.msra.mxu0 %v1399_v4 }
  0x80   :  { %516 = vmatprep.subr.bf16.mxu0 %v1404_v5 }
  0x83   :  { %517 = vmatpush1.bf16.msra.mxu0 %v1402_v6 }
  0x84   :  { %518 = vmatprep.subr.bf16.mxu0 %v1407_v7 }
  0x87   :  { %519 = vmatpush1.bf16.msra.mxu0 %v1405_v8 }
  0x88   :  { %1304 = vmatprep.subr.bf16.mxu0 %v1516_v17 }
  0x8a   :  { %537 = vmatmul.mubr.bf16.vlgmr.msra.gmra.mrb[0].mxu0 %v1408_v9 }
  0x8b   :  { %1312 = vmatprep.mubr.msk.bf16.mxu0 %vm1517_vm1, %v1516_v17  ;;  %1305 = vmatpush3.bf16.msra.mxu0 %v1441_v1 }
  0x8c   :  { %1306 = vmatprep.subr.bf16.mxu0 %v1516_v17 }
  0x8f   :  { %1307 = vmatpush3.bf16.msra.mxu0 %v1442_v2 }
  0x90   :  { %1308 = vmatprep.subr.bf16.mxu0 %v1516_v17 }
  0x93   :  { %1309 = vmatpush3.bf16.msra.mxu0 %v1443_v15 }
  0x94   :  { %1310 = vmatprep.subr.bf16.mxu0 %v1516_v17 }
  0x97   :  { %1311 = vmatpush3.bf16.msra.mxu0 %v1444_v16 }
 0x15d   :  { %v538_v24 = vpop.f32.mrb[0].mxu0 }
 0x15e   :  { %v1316_v25 = vadd.f32 %v538_v24, %v198_v22  ;;  %v540_v26 = vpop.f32.mrb[1].mxu0 }
 0x15f   :  { %v1317_v27 = vadd.f32 %v540_v26, %v202_v23  ;;  %v542_v28 = vpop.f32.mrb[2].mxu0 }
 0x160   :  { %v1318_v29 = vadd.f32 %v542_v28, %v198_v22  ;;  %v544_v30 = vpop.f32.mrb[3].mxu0  ;;  %v547_v32 = vmax.f32 %v1316_v25, 0.0 }
 0x161   :  { %v1319_v31 = vadd.f32 %v544_v30, %v202_v23  ;;  %v548_v34 = vmax.f32 %v1317_v27, 0.0 }
 0x162   :  { %v549_v33 = vmax.f32 %v1318_v29, 0.0 }
 0x163   :  { %v550_v10 = vmax.f32 %v1319_v31, 0.0 }
 0x164   :  { %v551_v35 = vpack.c.bf16 %v549_v33, %v547_v32 }
 0x165   :  { %v552_v36 = vpack.c.bf16 %v550_v10, %v548_v34 }
 0x167   :  { %719 = vmatprep.mubr.bf16.mxu1 %v552_v36 }
 0x168   :  { %720 = vmatmul.mubr.bf16.vlgmr.msra.gmra.mrb[0].mxu1 %v551_v35 }
 0x169   :  { %1265 = vmatpush3.bf16.msra.mxu1 %v1425_v37  ;;  %1280 = vmatprep.mubr.msk.bf16.mxu1 %vm1517_vm1, %v1516_v17 }
 0x16a   :  { %1266 = vmatprep.subr.bf16.mxu1 %v1516_v17 }
 0x16d   :  { %1267 = vmatpush3.bf16.msra.mxu1 %v1426_v38 }
 0x16e   :  { %1268 = vmatprep.subr.bf16.mxu1 %v1516_v17 }
 0x171   :  { %1269 = vmatpush3.bf16.msra.mxu1 %v1427_v39 }
 0x172   :  { %1270 = vmatprep.subr.bf16.mxu1 %v1516_v17 }
 0x175   :  { %1271 = vmatpush3.bf16.msra.mxu1 %v1428_v40 }
 0x176   :  { %1272 = vmatprep.subr.bf16.mxu1 %v1516_v17 }
 0x179   :  { %1273 = vmatpush3.bf16.msra.mxu1 %v1429_v41 }
 0x17a   :  { %1274 = vmatprep.subr.bf16.mxu1 %v1516_v17 }
 0x17d   :  { %1275 = vmatpush3.bf16.msra.mxu1 %v1430_v42 }
 0x17e   :  { %1276 = vmatprep.subr.bf16.mxu1 %v1516_v17 }
 0x181   :  { %1277 = vmatpush3.bf16.msra.mxu1 %v1431_v43 }
 0x182   :  { %1278 = vmatprep.subr.bf16.mxu1 %v1516_v17 }
 0x185   :  { %1279 = vmatpush3.bf16.msra.mxu1 %v1432_v44 }
 0x186   :  { %1284 = vmatprep.subr.bf16.mxu1 %v1516_v17 }
 0x23b   :  { %v1235_v45 = vpop.f32.mrb[0].mxu1 }
 0x23c   :  { %v1236_v47 = vpop.f32.mrb[1].mxu1 }
 0x23d   :  { %v1237_v48 = vadd.f32 %v1236_v47, %v1235_v45  ;;  %v1238_v49 = vpop.f32.mrb[2].mxu1 }
 0x23e   :  { %v1239_v50 = vpop.f32.mrb[3].mxu1 }
 0x23f   :  { %v722_v51 = vadd.f32 %v1237_v48, %v1168_v46  ;;  %v1240_v52 = vadd.f32 %v1239_v50, %v1238_v49 }
 0x241   :  { %v725_v53 = vadd.f32 %v1240_v52, %v1168_v46  ;;  %v728_v54 = vmax.f32 %v722_v51, 0.0 }
 0x243   :  { %v729_v55 = vmax.f32 %v725_v53, 0.0 }
 0x245   :  { %v730_v57 = vpack.c.bf16 %v729_v55, %v728_v54 }
 0x247   :  { %1281 = vmatmul.mubr.bf16.vlgmr.msra.gmra.mrb[4].mxu1 %v730_v57 }
 0x248   :  { %1285 = vmatpush3.bf16.msra.mxu1 %v1433_v56  ;;  %1300 = vmatprep.mubr.msk.bf16.mxu1 %vm1517_vm1, %v1516_v17 }
 0x249   :  { %1286 = vmatprep.subr.bf16.mxu1 %v1516_v17 }
 0x24c   :  { %1287 = vmatpush3.bf16.msra.mxu1 %v1434_v58 }
 0x24d   :  { %1288 = vmatprep.subr.bf16.mxu1 %v1516_v17 }
 0x250   :  { %1289 = vmatpush3.bf16.msra.mxu1 %v1435_v59 }
 0x251   :  { %1290 = vmatprep.subr.bf16.mxu1 %v1516_v17 }
 0x254   :  { %1291 = vmatpush3.bf16.msra.mxu1 %v1436_v60 }
 0x255   :  { %1292 = vmatprep.subr.bf16.mxu1 %v1516_v17 }
 0x258   :  { %1293 = vmatpush3.bf16.msra.mxu1 %v1437_v61 }
 0x259   :  { %1294 = vmatprep.subr.bf16.mxu1 %v1516_v17 }
 0x25c   :  { %1295 = vmatpush3.bf16.msra.mxu1 %v1438_v62 }
 0x25d   :  { %1296 = vmatprep.subr.bf16.mxu1 %v1516_v17 }
 0x260   :  { %1297 = vmatpush3.bf16.msra.mxu1 %v1439_v63 }
 0x261   :  { %1298 = vmatprep.subr.bf16.mxu1 %v1516_v17  ;;  %v1203_v17 = vld [vmem:[%s1780_s5 + $0x5] ss:$0 sm:$0xff] }
 0x264   :  { %1299 = vmatpush3.bf16.msra.mxu1 %v1440_v0 }
 0x31a   :  { %v835_v4 = vpop.f32.mrb[4].mxu1 }
 0x31b   :  { %v836_v5 = vadd.f32 %v1185_v3, %v835_v4  ;;  %v1282_v6 = vpop.f32.mrb[5].mxu1 }
 0x31c   :  { %v838_v7 = vpop.f32.mrb[6].mxu1 }
 0x31d   :  { %v839_v8 = vadd.f32 %v1185_v3, %v838_v7  ;;  %v1283_v9 = vpop.f32.mrb[7].mxu1  ;;  %v842_v11 = vmax.f32 %v836_v5, 0.0 }
 0x31f   :  { %v843_v12 = vmax.f32 %v839_v8, 0.0 }
 0x321   :  { %v844_v14 = vpack.c.bf16 %v843_v12, %v842_v11 }
 0x323   :  { %1301 = vmatmul.mubr.bf16.vlgmr.msra.gmra.mrb[8].mxu1 %v844_v14 }
 0x3f6   :  { %v949_v19 = vpop.f32.mrb[8].mxu1 }
 0x3f7   :  { %v950_v20 = vadd.f32 %v1194_v18, %v949_v19  ;;  %v1302_v21 = vpop.f32.mrb[9].mxu1 }
 0x3f8   :  { %v952_v22 = vpop.f32.mrb[10].mxu1 }
 0x3f9   :  { %v953_v23 = vadd.f32 %v1194_v18, %v952_v22  ;;  %v1303_v24 = vpop.f32.mrb[11].mxu1  ;;  %v956_v25 = vmax.f32 %v950_v20, 0.0 }
 0x3fb   :  { %v957_v26 = vmax.f32 %v953_v23, 0.0 }
 0x3fd   :  { %v958_v27 = vpack.c.bf16 %v957_v26, %v956_v25 }
 0x3ff   :  { %1313 = vmatmul.mubr.msk.bf16.vlgmr.msra.gmra.mrb[4].mxu0 %vm997_vm2, %v958_v27 }
 0x4d2   :  { %v1035_v28 = vpop.f32.mrb[4].mxu0 }
 0x4d3   :  { %v1036_v30 = vadd.f32 %v1203_v17, %v1035_v28  ;;  %v1314_v31 = vpop.f32.mrb[5].mxu0 }
 0x4d4   :  { %v1038_v32 = vpop.f32.mrb[6].mxu0 }
 0x4d5   :  { %v1039_v33 = vadd.f32 %v1203_v17, %v1038_v32  ;;  %v1315_v34 = vpop.f32.mrb[7].mxu0  ;;  %v1057_v10 = vsel %vm1734_vm5, %v1036_v30, -inf  ;;  %v1048_v35 = vsel %vm1044_vm6, %v1036_v30, -inf }
 0x4d6   :  { %v1059_v36 = vsel %vm1050_vm7, %v1057_v10, -inf  ;;  %v1051_v37 = vsel %vm1050_vm7, %v1048_v35, -inf }
 0x4d7   :  { %1060 = vmax.xlane.f32.xlu1 %v1059_v36  ;;  %1052 = vmax.xlane.f32.xlu0 %v1051_v37  ;;  %v1058_v38 = vsel %vm1734_vm5, %v1039_v33, -inf  ;;  %v1049_v39 = vsel %vm1044_vm6, %v1039_v33, -inf }
 0x4d8   :  { %v1062_v40 = vsel %vm1050_vm7, %v1058_v38, -inf  ;;  %v1054_v41 = vsel %vm1050_vm7, %v1049_v39, -inf }
 0x4db   :  { %1063 = vmax.xlane.f32.xlu1 %v1062_v40  ;;  %1055 = vmax.xlane.f32.xlu0 %v1054_v41 }
 0x564   :  { %v1061_v42 = vpop.xlane.xlu1 %1060  ;;  %v1053_v43 = vpop.xlane.xlu0 %1052 }
 0x565   :  { %v1079_v44 = vsub.f32 %v1036_v30, %v1061_v42  ;;  %v1065_v45 = vsub.f32 %v1036_v30, %v1053_v43 }
 0x567   :  { %v1081_v46 = vmul.f32 1.442695, %v1079_v44  ;;  %v1067_v47 = vmul.f32 1.442695, %v1065_v45 }
 0x568   :  { %v1064_v48 = vpop.xlane.xlu1 %1063  ;;  %v1056_v49 = vpop.xlane.xlu0 %1055 }
 0x569   :  { %1445 = vpow2.f32 %v1081_v46  ;;  %v1080_v50 = vsub.f32 %v1039_v33, %v1064_v48  ;;  %v1066_v51 = vsub.f32 %v1039_v33, %v1056_v49 }
 0x56a   :  { %1447 = vpow2.f32 %v1067_v47 }
 0x56b   :  { %v1083_v52 = vmul.f32 1.442695, %v1080_v50  ;;  %v1069_v53 = vmul.f32 1.442695, %v1066_v51 }
 0x56d   :  { %1449 = vpow2.f32 %v1083_v52 }
 0x56e   :  { %1451 = vpow2.f32 %v1069_v53 }
 0x573   :  { %v1446_v54 = vpop.eup %1445 }
 0x574   :  { %v1448_v55 = vpop.eup %1447  ;;  %v1085_v59 = vsel %vm1734_vm5, %v1446_v54, 0.0 }
 0x575   :  { %v1071_v56 = vsel %vm1044_vm6, %v1448_v55, 0.0  ;;  %v1087_v62 = vsel %vm1050_vm7, %v1085_v59, 0.0 }
 0x576   :  { %v1073_v57 = vsel %vm1050_vm7, %v1071_v56, 0.0 }
 0x577   :  { %v1450_v58 = vpop.eup %1449  ;;  %1074 = vadd.xlane.f32.xlu0 %v1073_v57 }
 0x578   :  { %v1452_v60 = vpop.eup %1451  ;;  %v1086_v0 = vsel %vm1734_vm5, %v1450_v58, 0.0 }
 0x579   :  { %v1072_v61 = vsel %vm1044_vm6, %v1452_v60, 0.0  ;;  %v1090_v1 = vsel %vm1050_vm7, %v1086_v0, 0.0 }
 0x57a   :  { %v1076_v63 = vsel %vm1050_vm7, %v1072_v61, 0.0 }
 0x57b   :  { %1088 = vadd.xlane.f32.xlu0 %v1087_v62  ;;  %1077 = vadd.xlane.f32.xlu1 %v1076_v63 }
 0x57f   :  { %1091 = vadd.xlane.f32.xlu1 %v1090_v1 }
 0x604   :  { %v1075_v2 = vpop.xlane.xlu0 %1074 }
 0x605   :  { %1453 = vlog2.f32 %v1075_v2 }
 0x608   :  { %v1078_v3 = vpop.xlane.xlu1 %1077  ;;  %v1089_v4 = vpop.xlane.xlu0 %1088 }
 0x609   :  { %1455 = vlog2.f32 %v1078_v3 }
 0x60a   :  { %1457 = vlog2.f32 %v1089_v4 }
 0x60c   :  { %v1092_v5 = vpop.xlane.xlu1 %1091 }
 0x60d   :  { %1459 = vlog2.f32 %v1092_v5 }
 0x60f   :  { %v1454_v6 = vpop.eup %1453 }
 0x610   :  { %v1094_v8 = vmul.f32 0.6931472, %v1454_v6 }
 0x612   :  { %v1097_v15 = vsub.f32 %v1065_v45, %v1094_v8 }
 0x613   :  { %v1456_v7 = vpop.eup %1455 }
 0x614   :  { %v1458_v9 = vpop.eup %1457  ;;  %v1096_v12 = vmul.f32 0.6931472, %v1456_v7 }
 0x615   :  { %v1100_v11 = vmul.f32 0.6931472, %v1458_v9 }
 0x616   :  { %v1098_v20 = vsub.f32 %v1066_v51, %v1096_v12 }
 0x617   :  { %v1460_v14 = vpop.eup %1459  ;;  %v1103_v16 = vsub.f32 %v1079_v44, %v1100_v11 }
 0x618   :  { %v1102_v18 = vmul.f32 0.6931472, %v1460_v14 }
 0x619   :  { %v1105_v19 = vsel %vm1044_vm6, %v1097_v15, %v1103_v16 }
 0x61a   :  { %1107 = vst.msk [vmem:[%s1783_s8] sm:$0xff] %vm1050_vm7, %v1105_v19  ;;  %v1104_v21 = vsub.f32 %v1080_v50, %v1102_v18 }
 0x61c   :  { %v1106_v22 = vsel %vm1044_vm6, %v1098_v20, %v1104_v21 }
 0x61d   :  { %1108 = vst.msk [vmem:[%s1783_s8 + $0x8] sm:$0xff] %vm1050_vm7, %v1106_v22 }
 0x61e   :  { %1113 = vsyncpa [#allocation8], 1 }
 0x61f   :  { %1114 = vsyncpa [#allocation10], 1 }

</bundles_post_ra>
